<compile_context>
chip_gen: v6e
topology: v6e:2x2x1
jax: 0.10.0
libtpu: 0.0.40
codegen_flags: <defaults>
</compile_context>

<pallas_src>
import functools

import jax
import jax.numpy as jnp
from jax.experimental import pallas as pl
from jax.experimental.pallas import tpu as pltpu

VMEM_LIMIT = 32 * 1024 * 1024   # explicit scoped-VMEM budget (safe on v5e/v6e/v7x)


def _round_up(x, m):
    return ((x + m - 1) // m) * m


def _pick_tile(dim, cap=512):
    # tile must be a multiple of 128 (lane/sublane constraint); cap at 512 which
    # hits ~85% of HBM roofline while fitting v7x's smaller VMEM with headroom.
    if dim >= cap:
        return cap
    return _round_up(dim, 128)


def _pad2(x, rows, cols):
    return jnp.pad(x, ((0, rows - x.shape[0]), (0, cols - x.shape[1])))


# --------------------- kernel 1: fused feature projections ------------------ #
def _feat_kernel(s1_ref, s2_ref, w_ref, bl_ref,
                 x_ref, p_ref, t_ref, acc1_ref, acc2_ref, *, hid):
    k = pl.program_id(1)

    @pl.when(k == 0)
    def _():
        acc1_ref[...] = jnp.zeros_like(acc1_ref)
        acc2_ref[...] = jnp.zeros_like(acc2_ref)

    w = w_ref[...]                                              # (FB, 3H)
    acc1_ref[...] += jnp.dot(s1_ref[...], w, preferred_element_type=jnp.float32)
    acc2_ref[...] += jnp.dot(s2_ref[...], w, preferred_element_type=jnp.float32)

    @pl.when(k == pl.num_programs(1) - 1)
    def _():
        a1 = acc1_ref[...]
        a2 = acc2_ref[...]
        bl = bl_ref[...]
        x_ref[...] = jnp.concatenate([a1[:, :hid], a2[:, :hid]], axis=1)
        p_ref[...] = jnp.concatenate([a1[:, hid:2 * hid], a2[:, hid:2 * hid]], axis=1)
        t_ref[...] = jnp.concatenate([jnp.tanh(a1[:, 2 * hid:] + bl),
                                      jnp.tanh(a2[:, 2 * hid:] + bl)], axis=1)


def _feat_pallas(s1p, s2p, w_allp, bl, hid, nb, fb):
    npad, fpad = s1p.shape
    grid = (npad // nb, fpad // fb)
    kernel = functools.partial(_feat_kernel, hid=hid)
    out_shape = (jax.ShapeDtypeStruct((npad, 2 * hid), jnp.float32),
                 jax.ShapeDtypeStruct((npad, 2 * hid), jnp.float32),
                 jax.ShapeDtypeStruct((npad, 2 * hid), jnp.float32))
    return pl.pallas_call(
        kernel,
        out_shape=out_shape,
        grid_spec=pltpu.PrefetchScalarGridSpec(
            num_scalar_prefetch=0,
            grid=grid,
            in_specs=[
                pl.BlockSpec((nb, fb), lambda i, k: (i, k)),        # seq1 tile
                pl.BlockSpec((nb, fb), lambda i, k: (i, k)),        # seq2 tile
                pl.BlockSpec((fb, 3 * hid), lambda i, k: (k, 0)),   # W_all tile
                pl.BlockSpec((1, hid), lambda i, k: (0, 0)),        # bl
            ],
            out_specs=(
                pl.BlockSpec((nb, 2 * hid), lambda i, k: (i, 0)),   # X
                pl.BlockSpec((nb, 2 * hid), lambda i, k: (i, 0)),   # P
                pl.BlockSpec((nb, 2 * hid), lambda i, k: (i, 0)),   # T
            ),
            scratch_shapes=[pltpu.VMEM((nb, 3 * hid), jnp.float32),
                            pltpu.VMEM((nb, 3 * hid), jnp.float32)],
        ),
        compiler_params=pltpu.CompilerParams(
            dimension_semantics=("parallel", "arbitrary"),
            vmem_limit_bytes=VMEM_LIMIT),
    )(s1p, s2p, w_allp, bl)


# ------------------ kernel 2: fused adj matmul for both GCNs ---------------- #
def _adj_kernel(adj_ref, x_ref, b2_ref, alpha_ref, h_ref, acc_ref):
    k = pl.program_id(1)

    @pl.when(k == 0)
    def _():
        acc_ref[...] = jnp.zeros_like(acc_ref)

    acc_ref[...] += jnp.dot(adj_ref[...], x_ref[...],
                            preferred_element_type=jnp.float32)

    @pl.when(k == pl.num_programs(1) - 1)
    def _():
        z = acc_ref[...] + b2_ref[...]
        alpha = alpha_ref[...]                               # (1,1), broadcasts
        h_ref[...] = jnp.where(z > 0, z, alpha * z)          # PReLU


def _adj_pallas(adjp, x, b2, alpha, hid, nb):
    npad = adjp.shape[0]
    grid = (npad // nb, npad // nb)
    return pl.pallas_call(
        _adj_kernel,
        out_shape=jax.ShapeDtypeStruct((npad, 2 * hid), jnp.float32),
        grid_spec=pltpu.PrefetchScalarGridSpec(
            num_scalar_prefetch=0,
            grid=grid,
            in_specs=[
                pl.BlockSpec((nb, nb), lambda i, k: (i, k)),        # adj tile
                pl.BlockSpec((nb, 2 * hid), lambda i, k: (k, 0)),   # X tile
                pl.BlockSpec((1, 2 * hid), lambda i, k: (0, 0)),    # [b|b]
                pl.BlockSpec((1, 1), lambda i, k: (0, 0)),          # PReLU alpha
            ],
            out_specs=pl.BlockSpec((nb, 2 * hid), lambda i, k: (i, 0)),
            scratch_shapes=[pltpu.VMEM((nb, 2 * hid), jnp.float32)],
        ),
        compiler_params=pltpu.CompilerParams(
            dimension_semantics=("parallel", "arbitrary"),
            vmem_limit_bytes=VMEM_LIMIT),
    )(adjp, x, b2, alpha)


# --------------------- kernel 3: InterDiscriminator ------------------------- #
def _disc_kernel(c_ref, we_t_ref, be_ref, bi_ref,
                 hx_ref, t_ref, p_ref, out_ref, *, hid):
    c = c_ref[...]                                                      # (1, H)
    ve = jnp.dot(c, we_t_ref[...], preferred_element_type=jnp.float32)  # (W_e @ c)^T
    be = be_ref[...]
    bi = bi_ref[...]

    hx = hx_ref[...]
    tt = t_ref[...]
    pp = p_ref[...]
    h1, h2 = hx[:, :hid], hx[:, hid:]
    t1, t2 = tt[:, :hid], tt[:, hid:]
    p1, p2 = pp[:, :hid], pp[:, hid:]

    def row_score(vec, mat):      # (1,H) x (NB,H)^T -> lane-dense (1, NB)
        return jnp.einsum('oh,nh->on', vec, mat, preferred_element_type=jnp.float32)

    sc1 = row_score(ve, h1) + be      # extrinsic +
    sc2 = row_score(ve, h2) + be      # extrinsic -
    sc3 = row_score(c, p1) + bi       # intrinsic +   (p = s @ W_i already applied)
    sc4 = row_score(c, p2) + bi       # intrinsic -
    sc5 = row_score(ve, t1) + be      # joint +
    sc6 = row_score(ve, t2) + be      # joint -

    pad = jnp.zeros((2, sc1.shape[1]), jnp.float32)
    out_ref[...] = jnp.concatenate([sc1, sc2, sc3, sc4, sc5, sc6, pad], axis=0)


def _disc_pallas(c, we_t, be, bi, hx, t, p, hid, nb):
    npad = hx.shape[0]
    grid = (npad // nb,)
    kernel = functools.partial(_disc_kernel, hid=hid)
    return pl.pallas_call(
        kernel,
        out_shape=jax.ShapeDtypeStruct((8, npad), jnp.float32),
        grid_spec=pltpu.PrefetchScalarGridSpec(
            num_scalar_prefetch=0,
            grid=grid,
            in_specs=[
                pl.BlockSpec((1, hid), lambda i: (0, 0)),            # c
                pl.BlockSpec((hid, hid), lambda i: (0, 0)),          # W_e^T
                pl.BlockSpec((1, 1), lambda i: (0, 0)),              # be
                pl.BlockSpec((1, 1), lambda i: (0, 0)),              # bi
                pl.BlockSpec((nb, 2 * hid), lambda i: (i, 0)),       # [h1|h2]
                pl.BlockSpec((nb, 2 * hid), lambda i: (i, 0)),       # [t1|t2]
                pl.BlockSpec((nb, 2 * hid), lambda i: (i, 0)),       # [p1|p2]
            ],
            out_specs=pl.BlockSpec((8, nb), lambda i: (0, i)),       # lane-dense scores
        ),
        compiler_params=pltpu.CompilerParams(
            dimension_semantics=("parallel",),
            vmem_limit_bytes=VMEM_LIMIT),
    )(c, we_t, be, bi, hx, t, p)


# ------------------------------ modeler ------------------------------------ #
def modeler_forward(params, seq1, seq2, adj, sparse=False):
    # dense (sparse=False / torch.bmm) path; size-1 batch dim squeezed.
    assert not sparse  # TODO(synk): sparse torch.spmm adjacency path not implemented
    s1 = jnp.squeeze(seq1, axis=0).astype(jnp.float32)
    s2 = jnp.squeeze(seq2, axis=0).astype(jnp.float32)
    a = jnp.squeeze(adj, axis=0).astype(jnp.float32)

    n, f = s1.shape
    hid = params["w_gcn_t"].shape[1]

    nb = _pick_tile(n)
    fb = _pick_tile(f)
    npad = _round_up(n, nb)
    fpad = _round_up(f, fb)

    s1p = _pad2(s1, npad, fpad)
    s2p = _pad2(s2, npad, fpad)
    adjp = _pad2(a, npad, npad)
    w_all = jnp.concatenate([params["w_gcn_t"], params["wi"], params["wl_t"]], axis=1)
    w_allp = _pad2(w_all, fpad, 3 * hid)

    # kernel 1: all seq-consuming projections while seq1/seq2 are resident
    x, p, t = _feat_pallas(s1p, s2p, w_allp, params["bl"], hid, nb, fb)

    # kernel 2: adj @ [Z1|Z2] (+bias, PReLU) -> [h1|h2]; adj read once for both GCNs
    b2 = jnp.concatenate([params["b_gcn"], params["b_gcn"]], axis=1)
    hx = _adj_pallas(adjp, x, b2, params["alpha"], hid, nb)

    # summary vector c = mean(h_1, 0): tiny (N,H) reduction, done as XLA glue
    c = jnp.mean(hx[:n, :hid], axis=0, keepdims=True)

    # kernel 3: discriminator scores, lane-dense (8, Npad)
    scores = _disc_pallas(c, params["we_t"], params["be"], params["bi"],
                          hx, t, p, hid, nb)
    # torch.cat((sc_1, ..., sc_6)) == row-major flatten of the (6, N) score matrix
    return scores[:6, :n].reshape(-1)


# ---------------------- deterministic parameter init ----------------------- #
def init_params(key, ft_size, hid_units):
    ks = jax.random.split(key, 8)

    def xavier(k, shape):
        limit = (6.0 / (shape[0] + shape[1])) ** 0.5
        return jax.random.uniform(k, shape, jnp.float32, -limit, limit)

    w_gcn = xavier(ks[0], (hid_units, ft_size))   # GCN nn.Linear(ft, hid, bias=False)
    we = xavier(ks[1], (hid_units, hid_units))    # nn.Bilinear(hid, hid, 1).weight[0]
    wi = xavier(ks[2], (ft_size, hid_units))      # nn.Bilinear(ft,  hid, 1).weight[0]
    wl = xavier(ks[3], (hid_units, ft_size))      # joint nn.Linear(ft, hid).weight
    # PyTorch fills these biases with 0.0 at init; use small random values here so
    # the numeric check exercises every bias path (forward semantics are unchanged).
    return dict(
        w_gcn_t=w_gcn.T,                                   # (F, H)
        b_gcn=0.1 * jax.random.normal(ks[4], (1, hid_units), jnp.float32),
        alpha=jnp.full((1, 1), 0.25, jnp.float32),         # nn.PReLU() default slope
        we_t=we.T,                                         # (H, H)
        wi=wi,                                             # (F, H)
        wl_t=wl.T,                                         # (F, H)
        bl=0.1 * jax.random.normal(ks[5], (1, hid_units), jnp.float32),
        be=0.1 * jax.random.normal(ks[6], (1, 1), jnp.float32),
        bi=0.1 * jax.random.normal(ks[7], (1, 1), jnp.float32),
    )


# --------------------------- pure-JAX reference ----------------------------- #
def reference_forward(params, seq1, seq2, adj):
    s1 = jnp.squeeze(seq1, 0)
    s2 = jnp.squeeze(seq2, 0)
    a = jnp.squeeze(adj, 0)
    alpha = params["alpha"][0, 0]

    def gcn(s):
        z = a @ (s @ params["w_gcn_t"]) + params["b_gcn"]
        return jnp.where(z > 0, z, alpha * z)

    h1 = gcn(s1)
    h2 = gcn(s2)
    c = jnp.mean(h1, 0)
    ve = params["we_t"].T @ c            # W_e @ c
    vi = params["wi"] @ c                # W_i @ c
    t1 = jnp.tanh(s1 @ params["wl_t"] + params["bl"])
    t2 = jnp.tanh(s2 @ params["wl_t"] + params["bl"])
    be = params["be"][0, 0]
    bi = params["bi"][0, 0]
    sc = [h1 @ ve + be, h2 @ ve + be, s1 @ vi + bi,
          s2 @ vi + bi, t1 @ ve + be, t2 @ ve + be]
    return jnp.concatenate(sc)


if __name__ == "__main__":
    N, F, H = 16, 32, 32
    key = jax.random.PRNGKey(0)
    kp, k1, k2, ka = jax.random.split(key, 4)

    params = init_params(kp, F, H)
    seq1 = jax.random.normal(k1, (1, N, F), jnp.float32)
    seq2 = jax.random.normal(k2, (1, N, F), jnp.float32)
    adj_raw = jax.random.uniform(ka, (N, N), jnp.float32)
    adj = (adj_raw / jnp.sum(adj_raw, axis=1, keepdims=True))[None]   # (1, N, N) dense

    out = jax.block_until_ready(modeler_forward(params, seq1, seq2, adj, sparse=False))
    ref = reference_forward(params, seq1, seq2, adj)

    assert out.shape == (6 * N,), out.shape
    err = float(jnp.max(jnp.abs(out - ref)))
    assert jnp.allclose(out, ref, atol=1e-4, rtol=1e-4), err
    print("KERNEL_OK")
</pallas_src>

<mosaic_0001>
module attributes {stable_mosaic.version = 11 : i64} {
  func.func @_feat_kernel(%arg0: i32, %arg1: i32, %arg2: memref<128x128xf32, #tpu.memory_space<vmem>>, %arg3: memref<128x128xf32, #tpu.memory_space<vmem>>, %arg4: memref<128x96xf32, #tpu.memory_space<vmem>>, %arg5: memref<1x32xf32, #tpu.memory_space<vmem>>, %arg6: memref<128x64xf32, #tpu.memory_space<vmem>>, %arg7: memref<128x64xf32, #tpu.memory_space<vmem>>, %arg8: memref<128x64xf32, #tpu.memory_space<vmem>>, %arg9: memref<128x96xf32, #tpu.memory_space<vmem>>, %arg10: memref<128x96xf32, #tpu.memory_space<vmem>>) attributes {dimension_semantics = [#tpu.dimension_semantics<parallel>, #tpu.dimension_semantics<arbitrary>], iteration_bounds = array<i64: 1, 1>, scalar_prefetch = 0 : i64, scratch_operands = 2 : i64, tpu.core_type = #tpu.core_type<tc>, window_params = [{transform_indices = @transform_0, window_bounds = array<i64: 128, 128>}, {transform_indices = @transform_1, window_bounds = array<i64: 128, 128>}, {transform_indices = @transform_2, window_bounds = array<i64: 128, 96>}, {pipeline_mode = #tpu.pipeline_mode<synchronous>, transform_indices = @transform_3, window_bounds = array<i64: 1, 32>}, {transform_indices = @transform_4, window_bounds = array<i64: 128, 64>}, {transform_indices = @transform_5, window_bounds = array<i64: 128, 64>}, {transform_indices = @transform_6, window_bounds = array<i64: 128, 64>}]} {
    %c0_i32 = arith.constant 0 : i32
    %0 = arith.cmpi eq, %arg1, %c0_i32 : i32
    %1 = arith.extui %0 : i1 to i32
    %c0_i32_0 = arith.constant 0 : i32
    %2 = arith.cmpi ne, %1, %c0_i32_0 : i32
    scf.if %2 {
      %cst_17 = arith.constant 0.000000e+00 : f32
      %17 = vector.broadcast %cst_17 : f32 to vector<128x96xf32>
      %c0_18 = arith.constant 0 : index
      %c0_19 = arith.constant 0 : index
      %18 = vector.load %arg9[%c0_18, %c0_19] : memref<128x96xf32, #tpu.memory_space<vmem>>, vector<128x96xf32>
      tpu.vector_store %arg9[%c0_18, %c0_19], %17 {strides = array<i32>} : memref<128x96xf32, #tpu.memory_space<vmem>>, vector<128x96xf32>,
      %cst_20 = arith.constant 0.000000e+00 : f32
      %19 = vector.broadcast %cst_20 : f32 to vector<128x96xf32>
      %c0_21 = arith.constant 0 : index
      %c0_22 = arith.constant 0 : index
      %20 = vector.load %arg10[%c0_21, %c0_22] : memref<128x96xf32, #tpu.memory_space<vmem>>, vector<128x96xf32>
      tpu.vector_store %arg10[%c0_21, %c0_22], %19 {strides = array<i32>} : memref<128x96xf32, #tpu.memory_space<vmem>>, vector<128x96xf32>,
    } else {
    }
    %c0 = arith.constant 0 : index
    %c0_1 = arith.constant 0 : index
    %3 = vector.load %arg4[%c0, %c0_1] : memref<128x96xf32, #tpu.memory_space<vmem>>, vector<128x96xf32>
    %c0_2 = arith.constant 0 : index
    %c0_3 = arith.constant 0 : index
    %4 = vector.load %arg9[%c0_2, %c0_3] : memref<128x96xf32, #tpu.memory_space<vmem>>, vector<128x96xf32>
    %c0_4 = arith.constant 0 : index
    %c0_5 = arith.constant 0 : index
    %5 = vector.load %arg2[%c0_4, %c0_5] : memref<128x128xf32, #tpu.memory_space<vmem>>, vector<128x128xf32>
    %cst = arith.constant dense<0.000000e+00> : vector<128x96xf32>
    %6 = tpu.matmul %5, %3, %cst {dimension_numbers = #tpu.dot_dimension_numbers<[1], [0], [0], [1], [0, 0, 1, 1], [], []>} : vector<128x128xf32>, vector<128x96xf32>, vector<128x96xf32> -> vector<128x96xf32>
    %7 = arith.addf %4, %6 : vector<128x96xf32>
    %c0_6 = arith.constant 0 : index
    %c0_7 = arith.constant 0 : index
    %8 = vector.load %arg9[%c0_6, %c0_7] : memref<128x96xf32, #tpu.memory_space<vmem>>, vector<128x96xf32>
    tpu.vector_store %arg9[%c0_6, %c0_7], %7 {strides = array<i32>} : memref<128x96xf32, #tpu.memory_space<vmem>>, vector<128x96xf32>,
    %c0_8 = arith.constant 0 : index
    %c0_9 = arith.constant 0 : index
    %9 = vector.load %arg10[%c0_8, %c0_9] : memref<128x96xf32, #tpu.memory_space<vmem>>, vector<128x96xf32>
    %c0_10 = arith.constant 0 : index
    %c0_11 = arith.constant 0 : index
    %10 = vector.load %arg3[%c0_10, %c0_11] : memref<128x128xf32, #tpu.memory_space<vmem>>, vector<128x128xf32>
    %cst_12 = arith.constant dense<0.000000e+00> : vector<128x96xf32>
    %11 = tpu.matmul %10, %3, %cst_12 {dimension_numbers = #tpu.dot_dimension_numbers<[1], [0], [0], [1], [0, 0, 1, 1], [], []>} : vector<128x128xf32>, vector<128x96xf32>, vector<128x96xf32> -> vector<128x96xf32>
    %12 = arith.addf %9, %11 : vector<128x96xf32>
    %c0_13 = arith.constant 0 : index
    %c0_14 = arith.constant 0 : index
    %13 = vector.load %arg10[%c0_13, %c0_14] : memref<128x96xf32, #tpu.memory_space<vmem>>, vector<128x96xf32>
    tpu.vector_store %arg10[%c0_13, %c0_14], %12 {strides = array<i32>} : memref<128x96xf32, #tpu.memory_space<vmem>>, vector<128x96xf32>,
    %c0_i32_15 = arith.constant 0 : i32
    %14 = arith.cmpi eq, %arg1, %c0_i32_15 : i32
    %15 = arith.extui %14 : i1 to i32
    %c0_i32_16 = arith.constant 0 : i32
    %16 = arith.cmpi ne, %15, %c0_i32_16 : i32
    scf.if %16 {
      %c0_17 = arith.constant 0 : index
      %c0_18 = arith.constant 0 : index
      %17 = vector.load %arg9[%c0_17, %c0_18] : memref<128x96xf32, #tpu.memory_space<vmem>>, vector<128x96xf32>
      %c0_19 = arith.constant 0 : index
      %c0_20 = arith.constant 0 : index
      %18 = vector.load %arg10[%c0_19, %c0_20] : memref<128x96xf32, #tpu.memory_space<vmem>>, vector<128x96xf32>
      %c0_21 = arith.constant 0 : index
      %c0_22 = arith.constant 0 : index
      %19 = vector.load %arg5[%c0_21, %c0_22] : memref<1x32xf32, #tpu.memory_space<vmem>>, vector<1x32xf32>
      %20 = vector.extract_strided_slice %17 {offsets = [0, 0], sizes = [128, 32], strides = [1, 1]} : vector<128x96xf32> to vector<128x32xf32>
      %21 = vector.extract_strided_slice %18 {offsets = [0, 0], sizes = [128, 32], strides = [1, 1]} : vector<128x96xf32> to vector<128x32xf32>
      %22 = tpu.concatenate %20, %21 in 1 : vector<128x32xf32>, vector<128x32xf32> -> vector<128x64xf32>
      %c0_23 = arith.constant 0 : index
      %c0_24 = arith.constant 0 : index
      %23 = vector.load %arg6[%c0_23, %c0_24] : memref<128x64xf32, #tpu.memory_space<vmem>>, vector<128x64xf32>
      tpu.vector_store %arg6[%c0_23, %c0_24], %22 {strides = array<i32>} : memref<128x64xf32, #tpu.memory_space<vmem>>, vector<128x64xf32>,
      %24 = vector.extract_strided_slice %17 {offsets = [0, 32], sizes = [128, 32], strides = [1, 1]} : vector<128x96xf32> to vector<128x32xf32>
      %25 = vector.extract_strided_slice %18 {offsets = [0, 32], sizes = [128, 32], strides = [1, 1]} : vector<128x96xf32> to vector<128x32xf32>
      %26 = tpu.concatenate %24, %25 in 1 : vector<128x32xf32>, vector<128x32xf32> -> vector<128x64xf32>
      %c0_25 = arith.constant 0 : index
      %c0_26 = arith.constant 0 : index
      %27 = vector.load %arg7[%c0_25, %c0_26] : memref<128x64xf32, #tpu.memory_space<vmem>>, vector<128x64xf32>
      tpu.vector_store %arg7[%c0_25, %c0_26], %26 {strides = array<i32>} : memref<128x64xf32, #tpu.memory_space<vmem>>, vector<128x64xf32>,
      %28 = vector.extract_strided_slice %17 {offsets = [0, 64], sizes = [128, 32], strides = [1, 1]} : vector<128x96xf32> to vector<128x32xf32>
      %29 = vector.broadcast %19 : vector<1x32xf32> to vector<128x32xf32>
      %30 = arith.addf %28, %29 : vector<128x32xf32>
      %31 = math.tanh %30 : vector<128x32xf32>
      %32 = vector.extract_strided_slice %18 {offsets = [0, 64], sizes = [128, 32], strides = [1, 1]} : vector<128x96xf32> to vector<128x32xf32>
      %33 = vector.broadcast %19 : vector<1x32xf32> to vector<128x32xf32>
      %34 = arith.addf %32, %33 : vector<128x32xf32>
      %35 = math.tanh %34 : vector<128x32xf32>
      %36 = tpu.concatenate %31, %35 in 1 : vector<128x32xf32>, vector<128x32xf32> -> vector<128x64xf32>
      %c0_27 = arith.constant 0 : index
      %c0_28 = arith.constant 0 : index
      %37 = vector.load %arg8[%c0_27, %c0_28] : memref<128x64xf32, #tpu.memory_space<vmem>>, vector<128x64xf32>
      tpu.vector_store %arg8[%c0_27, %c0_28], %36 {strides = array<i32>} : memref<128x64xf32, #tpu.memory_space<vmem>>, vector<128x64xf32>,
    } else {
    }
    return
  }
  func.func @transform_0(%arg0: i32, %arg1: i32) -> (i32, i32) {
    %c0_i32 = arith.constant 0 : i32
    return %arg0, %arg1 : i32, i32
  }
  func.func @transform_1(%arg0: i32, %arg1: i32) -> (i32, i32) {
    %c0_i32 = arith.constant 0 : i32
    return %arg0, %arg1 : i32, i32
  }
  func.func @transform_2(%arg0: i32, %arg1: i32) -> (i32, i32) {
    %c0_i32 = arith.constant 0 : i32
    %c0_i32_0 = arith.constant 0 : i32
    return %arg1, %c0_i32 : i32, i32
  }
  func.func @transform_3(%arg0: i32, %arg1: i32) -> (i32, i32) {
    %c0_i32 = arith.constant 0 : i32
    %c0_i32_0 = arith.constant 0 : i32
    %c0_i32_1 = arith.constant 0 : i32
    return %c0_i32, %c0_i32_0 : i32, i32
  }
  func.func @transform_4(%arg0: i32, %arg1: i32) -> (i32, i32) {
    %c0_i32 = arith.constant 0 : i32
    %c0_i32_0 = arith.constant 0 : i32
    return %arg0, %c0_i32 : i32, i32
  }
  func.func @transform_5(%arg0: i32, %arg1: i32) -> (i32, i32) {
    %c0_i32 = arith.constant 0 : i32
    %c0_i32_0 = arith.constant 0 : i32
    return %arg0, %c0_i32 : i32, i32
  }
  func.func @transform_6(%arg0: i32, %arg1: i32) -> (i32, i32) {
    %c0_i32 = arith.constant 0 : i32
    %c0_i32_0 = arith.constant 0 : i32
    return %arg0, %c0_i32 : i32, i32
  }
}

</mosaic_0001>

<bundles_post_ra>
// kernel: tpu_custom_call.1
= control target key start
LH: loop header
LB: loop body
LE: loop exit
PB: predicated region body
PF: predicated region fallthrough
CT: control target
= control target key end

     0   :  { %12 = vsyncpa [#allocation5], 0  ;;  %s1251_s21 = smov [#allocation4]   ;;  %s1958_s0 = inlined_call_operand.vmem [shape: f32[128,128], index: 0, kind: input, shape index: {}]   ;;  %s1959_s1 = inlined_call_operand.hbm [shape: f32[128,128], index: 1, kind: input, shape index: {}]   ;;  %s1960_s2 = inlined_call_operand.vmem [shape: f32[128,96], index: 2, kind: input, shape index: {}]   ;;  %s1961_s3 = inlined_call_operand.vmem [shape: f32[1,32], index: 3, kind: input, shape index: {}]   ;;  %s1962_s4 = inlined_call_operand.vmem [shape: f32[128,64], index: 4, kind: output, shape index: {0}]   ;;  %s1963_s5 = inlined_call_operand.vmem [shape: f32[128,64], index: 5, kind: output, shape index: {1}]   ;;  %s1964_s6 = inlined_call_operand.vmem [shape: f32[128,64], index: 6, kind: output, shape index: {2}]  }
   0x1   :  { %s20_s22 = sshll.u32 %s1251_s21, 4  ;;  %s21_s22 = int_to_ptr.vmem [resolvable:$true] %s20_s22 }
   0x2   :  { %s1237_s23 = scalar_lea.vmem %s21_s22, 2048  ;;  %p1242_p1 = scmp.lt.s32.totalorder %s21_s22, %s21_s22 }
   0x3   :  { %p1238_p0 = scmp.ne.s32.totalorder %s21_s22, %s1237_s23  ;;  %p1243_p2 = scmp.lt.s32.totalorder %s1237_s23, %s1237_s23 }
   0x5   :  { %p1244_p3 = por %p1243_p2, %p1242_p1 }
   0x7   :  { %p1245_p4 = pnand %p1244_p3, %p1238_p0 }
   0x9   :  { %1248 = shalt.err (!%p1245_p4)
}
   0xa   :  { %s1252_s24 = smov 128   ;;  %s1253_s25 = smov 8  }
   0xb   :  { %26 = dma.hbm_to_vmem [thread:$0]  %s1959_s1, 2048, %s21_s22, [#allocation5], %s1252_s24, %s1252_s24, %s1253_s25  }
   0xc   :  { %1249 = dma.done.wait [#allocation5], 2048  }
   0xd   :  { %1250 = vsyncadd [#allocation5], 4294965248  ;;  %vm38_vm0 = vcmask 785408   ;;  %v1254_v0 = vmov 0.0   ;;  %v86_v1 = vld [vmem:[%s1960_s2 + $0x78] sm:$0xff]  ;;  %v85_v2 = vld [vmem:[%s1960_s2 + $0x70] sm:$0xff] }
   0xe   :  { %40 = vst.msk [vmem:[#allocation2 + $0x8] sm:$0xff] %vm38_vm0, %v1254_v0  ;;  %39 = vst.msk [vmem:[#allocation2] sm:$0xff] %vm38_vm0, %v1254_v0  ;;  %1046 = vmatprep.subr.mxu0 %v86_v1  ;;  %1102 = vmatprep.subr.mxu1 %v86_v1  ;;  %v84_v3 = vld [vmem:[%s1960_s2 + $0x68] sm:$0xff]  ;;  %v83_v4 = vld [vmem:[%s1960_s2 + $0x60] sm:$0xff]  ;;  %s1255_s21 = smov 64   ;;  %s1257_s17 = smov 96  }
   0xf   :  { %41 = vst.msk [vmem:[#allocation2 + $0x10] sm:$0xff] %vm38_vm0, %v1254_v0  ;;  %42 = vst.msk [vmem:[#allocation2 + $0x18] sm:$0xff] %vm38_vm0, %v1254_v0  ;;  %1047 = vmatpush3.msra.mxu0 %v86_v1  ;;  %1103 = vmatpush3.msra.mxu1 %v86_v1  ;;  %v82_v5 = vld [vmem:[%s1960_s2 + $0x58] sm:$0xff]  ;;  %v81_v6 = vld [vmem:[%s1960_s2 + $0x50] sm:$0xff]  ;;  %vm606_vm1 = vcmask 261120   ;;  %vm623_vm2 = vcmask 523264  }
  0x10   :  { %43 = vst.msk [vmem:[#allocation2 + $0x20] sm:$0xff] %vm38_vm0, %v1254_v0  ;;  %44 = vst.msk [vmem:[#allocation2 + $0x28] sm:$0xff] %vm38_vm0, %v1254_v0  ;;  %1048 = vmatprep.subr.mxu0 %v85_v2  ;;  %1104 = vmatprep.subr.mxu1 %v85_v2  ;;  %v80_v7 = vld [vmem:[%s1960_s2 + $0x48] sm:$0xff]  ;;  %v79_v8 = vld [vmem:[%s1960_s2 + $0x40] sm:$0xff] }
  0x11   :  { %45 = vst.msk [vmem:[#allocation2 + $0x30] sm:$0xff] %vm38_vm0, %v1254_v0  ;;  %46 = vst.msk [vmem:[#allocation2 + $0x38] sm:$0xff] %vm38_vm0, %v1254_v0  ;;  %1049 = vmatpush3.msra.mxu0 %v85_v2  ;;  %1105 = vmatpush3.msra.mxu1 %v85_v2  ;;  %v78_v9 = vld [vmem:[%s1960_s2 + $0x38] sm:$0xff]  ;;  %v77_v10 = vld [vmem:[%s1960_s2 + $0x30] sm:$0xff] }
  0x12   :  { %47 = vst.msk [vmem:[#allocation2 + $0x40] sm:$0xff] %vm38_vm0, %v1254_v0  ;;  %48 = vst.msk [vmem:[#allocation2 + $0x48] sm:$0xff] %vm38_vm0, %v1254_v0  ;;  %1050 = vmatprep.subr.mxu0 %v84_v3  ;;  %1106 = vmatprep.subr.mxu1 %v84_v3  ;;  %v76_v11 = vld [vmem:[%s1960_s2 + $0x28] sm:$0xff]  ;;  %v75_v12 = vld [vmem:[%s1960_s2 + $0x20] sm:$0xff] }
  0x13   :  { %49 = vst.msk [vmem:[#allocation2 + $0x50] sm:$0xff] %vm38_vm0, %v1254_v0  ;;  %50 = vst.msk [vmem:[#allocation2 + $0x58] sm:$0xff] %vm38_vm0, %v1254_v0  ;;  %1051 = vmatpush3.msra.mxu0 %v84_v3  ;;  %1107 = vmatpush3.msra.mxu1 %v84_v3  ;;  %v74_v13 = vld [vmem:[%s1960_s2 + $0x18] sm:$0xff]  ;;  %v73_v14 = vld [vmem:[%s1960_s2 + $0x10] sm:$0xff] }
  0x14   :  { %51 = vst.msk [vmem:[#allocation2 + $0x60] sm:$0xff] %vm38_vm0, %v1254_v0  ;;  %52 = vst.msk [vmem:[#allocation2 + $0x68] sm:$0xff] %vm38_vm0, %v1254_v0  ;;  %1052 = vmatprep.subr.mxu0 %v83_v4  ;;  %1108 = vmatprep.subr.mxu1 %v83_v4  ;;  %v72_v15 = vld [vmem:[%s1960_s2 + $0x8] sm:$0xff]  ;;  %v71_v16 = vld [vmem:[%s1960_s2] sm:$0xff] }
  0x15   :  { %53 = vst.msk [vmem:[#allocation2 + $0x70] sm:$0xff] %vm38_vm0, %v1254_v0  ;;  %54 = vst.msk [vmem:[#allocation2 + $0x78] sm:$0xff] %vm38_vm0, %v1254_v0  ;;  %1053 = vmatpush3.msra.mxu0 %v83_v4  ;;  %1109 = vmatpush3.msra.mxu1 %v83_v4  ;;  %v103_v17 = vld [vmem:[%s1958_s0] sm:$0xff]  ;;  %v104_v19 = vld [vmem:[%s1958_s0 + $0x8] sm:$0xff] }
  0x16   :  { %55 = vst.msk [vmem:[#allocation3] sm:$0xff] %vm38_vm0, %v1254_v0  ;;  %56 = vst.msk [vmem:[#allocation3 + $0x8] sm:$0xff] %vm38_vm0, %v1254_v0  ;;  %1054 = vmatprep.subr.mxu0 %v82_v5  ;;  %1110 = vmatprep.subr.mxu1 %v82_v5  ;;  %v313_v18 = vld [vmem:[#allocation4] sm:$0xff]  ;;  %v314_v20 = vld [vmem:[#allocation4 + $0x8] sm:$0xff] }
  0x17   :  { %57 = vst.msk [vmem:[#allocation3 + $0x10] sm:$0xff] %vm38_vm0, %v1254_v0  ;;  %58 = vst.msk [vmem:[#allocation3 + $0x18] sm:$0xff] %vm38_vm0, %v1254_v0  ;;  %1055 = vmatpush3.msra.mxu0 %v82_v5  ;;  %1111 = vmatpush3.msra.mxu1 %v82_v5  ;;  %v105_v21 = vld [vmem:[%s1958_s0 + $0x10] sm:$0xff]  ;;  %v981_v23 = vld [vmem:[%s1961_s3] ss:$0 sm:$0xff] }
  0x18   :  { %59 = vst.msk [vmem:[#allocation3 + $0x20] sm:$0xff] %vm38_vm0, %v1254_v0  ;;  %60 = vst.msk [vmem:[#allocation3 + $0x28] sm:$0xff] %vm38_vm0, %v1254_v0  ;;  %1056 = vmatprep.subr.mxu0 %v81_v6  ;;  %1112 = vmatprep.subr.mxu1 %v81_v6  ;;  %v315_v22 = vld [vmem:[#allocation4 + $0x10] sm:$0xff]  ;;  %v106_v24 = vld [vmem:[%s1958_s0 + $0x18] sm:$0xff] }
  0x19   :  { %61 = vst.msk [vmem:[#allocation3 + $0x30] sm:$0xff] %vm38_vm0, %v1254_v0  ;;  %62 = vst.msk [vmem:[#allocation3 + $0x38] sm:$0xff] %vm38_vm0, %v1254_v0  ;;  %1057 = vmatpush3.msra.mxu0 %v81_v6  ;;  %1113 = vmatpush3.msra.mxu1 %v81_v6  ;;  %v316_v25 = vld [vmem:[#allocation4 + $0x18] sm:$0xff]  ;;  %v107_v26 = vld [vmem:[%s1958_s0 + $0x20] sm:$0xff] }
  0x1a   :  { %63 = vst.msk [vmem:[#allocation3 + $0x40] sm:$0xff] %vm38_vm0, %v1254_v0  ;;  %64 = vst.msk [vmem:[#allocation3 + $0x48] sm:$0xff] %vm38_vm0, %v1254_v0  ;;  %1058 = vmatprep.subr.mxu0 %v80_v7  ;;  %1114 = vmatprep.subr.mxu1 %v80_v7  ;;  %v317_v27 = vld [vmem:[#allocation4 + $0x20] sm:$0xff]  ;;  %v108_v28 = vld [vmem:[%s1958_s0 + $0x28] sm:$0xff] }
  0x1b   :  { %65 = vst.msk [vmem:[#allocation3 + $0x50] sm:$0xff] %vm38_vm0, %v1254_v0  ;;  %66 = vst.msk [vmem:[#allocation3 + $0x58] sm:$0xff] %vm38_vm0, %v1254_v0  ;;  %1059 = vmatpush3.msra.mxu0 %v80_v7  ;;  %1115 = vmatpush3.msra.mxu1 %v80_v7  ;;  %v318_v29 = vld [vmem:[#allocation4 + $0x28] sm:$0xff]  ;;  %v109_v30 = vld [vmem:[%s1958_s0 + $0x30] sm:$0xff] }
  0x1c   :  { %67 = vst.msk [vmem:[#allocation3 + $0x60] sm:$0xff] %vm38_vm0, %v1254_v0  ;;  %68 = vst.msk [vmem:[#allocation3 + $0x68] sm:$0xff] %vm38_vm0, %v1254_v0  ;;  %1060 = vmatprep.subr.mxu0 %v79_v8  ;;  %1116 = vmatprep.subr.mxu1 %v79_v8  ;;  %v319_v31 = vld [vmem:[#allocation4 + $0x30] sm:$0xff]  ;;  %v110_v32 = vld [vmem:[%s1958_s0 + $0x38] sm:$0xff] }
  0x1d   :  { %69 = vst.msk [vmem:[#allocation3 + $0x70] sm:$0xff] %vm38_vm0, %v1254_v0  ;;  %70 = vst.msk [vmem:[#allocation3 + $0x78] sm:$0xff] %vm38_vm0, %v1254_v0  ;;  %1061 = vmatpush3.msra.mxu0 %v79_v8  ;;  %1117 = vmatpush3.msra.mxu1 %v79_v8  ;;  %v320_v33 = vld [vmem:[#allocation4 + $0x38] sm:$0xff]  ;;  %v111_v34 = vld [vmem:[%s1958_s0 + $0x40] sm:$0xff] }
  0x1e   :  { %1062 = vmatprep.subr.mxu0 %v78_v9  ;;  %1118 = vmatprep.subr.mxu1 %v78_v9  ;;  %v321_v35 = vld [vmem:[#allocation4 + $0x40] sm:$0xff]  ;;  %v112_v36 = vld [vmem:[%s1958_s0 + $0x48] sm:$0xff]  ;;  %v113_v38 = vld [vmem:[%s1958_s0 + $0x50] sm:$0xff] }
  0x1f   :  { %1063 = vmatpush3.msra.mxu0 %v78_v9  ;;  %1119 = vmatpush3.msra.mxu1 %v78_v9  ;;  %v322_v37 = vld [vmem:[#allocation4 + $0x48] sm:$0xff]  ;;  %v323_v39 = vld [vmem:[#allocation4 + $0x50] sm:$0xff]  ;;  %v114_v40 = vld [vmem:[%s1958_s0 + $0x58] sm:$0xff] }
  0x20   :  { %1064 = vmatprep.subr.mxu0 %v77_v10  ;;  %1120 = vmatprep.subr.mxu1 %v77_v10  ;;  %v324_v41 = vld [vmem:[#allocation4 + $0x58] sm:$0xff]  ;;  %v115_v42 = vld [vmem:[%s1958_s0 + $0x60] sm:$0xff]  ;;  %v116_v44 = vld [vmem:[%s1958_s0 + $0x68] sm:$0xff] }
  0x21   :  { %1065 = vmatpush3.msra.mxu0 %v77_v10  ;;  %1121 = vmatpush3.msra.mxu1 %v77_v10  ;;  %v325_v43 = vld [vmem:[#allocation4 + $0x60] sm:$0xff]  ;;  %v326_v45 = vld [vmem:[#allocation4 + $0x68] sm:$0xff]  ;;  %v117_v46 = vld [vmem:[%s1958_s0 + $0x70] sm:$0xff] }
  0x22   :  { %1066 = vmatprep.subr.mxu0 %v76_v11  ;;  %1122 = vmatprep.subr.mxu1 %v76_v11  ;;  %v327_v47 = vld [vmem:[#allocation4 + $0x70] sm:$0xff]  ;;  %v118_v48 = vld [vmem:[%s1958_s0 + $0x78] sm:$0xff]  ;;  %v88_v50 = vld [vmem:[#allocation2 + $0x8] sm:$0xff]  ;;  %s1256_s0 = smov 32  }
  0x23   :  { %1067 = vmatpush3.msra.mxu0 %v76_v11  ;;  %1123 = vmatpush3.msra.mxu1 %v76_v11  ;;  %v328_v49 = vld [vmem:[#allocation4 + $0x78] sm:$0xff]  ;;  %v298_v51 = vld [vmem:[#allocation3 + $0x8] sm:$0xff]  ;;  %v87_v54 = vld [vmem:[#allocation2] sm:$0xff] }
  0x24   :  { %1068 = vmatprep.subr.mxu0 %v75_v12  ;;  %1124 = vmatprep.subr.mxu1 %v75_v12  ;;  %v297_v55 = vld [vmem:[#allocation3] sm:$0xff]  ;;  %v90_v60 = vld [vmem:[#allocation2 + $0x18] sm:$0xff]  ;;  %v89_v2 = vld [vmem:[#allocation2 + $0x10] sm:$0xff] }
  0x25   :  { %1069 = vmatpush3.msra.mxu0 %v75_v12  ;;  %1125 = vmatpush3.msra.mxu1 %v75_v12  ;;  %v300_v61 = vld [vmem:[#allocation3 + $0x18] sm:$0xff]  ;;  %v299_v3 = vld [vmem:[#allocation3 + $0x10] sm:$0xff]  ;;  %v92_v8 = vld [vmem:[#allocation2 + $0x28] sm:$0xff] }
  0x26   :  { %1070 = vmatprep.subr.mxu0 %v74_v13  ;;  %1126 = vmatprep.subr.mxu1 %v74_v13  ;;  %v302_v9 = vld [vmem:[#allocation3 + $0x28] sm:$0xff] }
  0x27   :  { %1071 = vmatpush3.msra.mxu0 %v74_v13  ;;  %1127 = vmatpush3.msra.mxu1 %v74_v13 }
  0x28   :  { %1072 = vmatprep.subr.mxu0 %v73_v14  ;;  %1128 = vmatprep.subr.mxu1 %v73_v14 }
  0x29   :  { %1073 = vmatpush3.msra.mxu0 %v73_v14  ;;  %1129 = vmatpush3.msra.mxu1 %v73_v14  ;;  %v91_v14 = vld [vmem:[#allocation2 + $0x20] sm:$0xff] }
  0x2a   :  { %1074 = vmatprep.subr.mxu0 %v72_v15  ;;  %1130 = vmatprep.subr.mxu1 %v72_v15 }
  0x2b   :  { %1075 = vmatpush3.msra.mxu0 %v72_v15  ;;  %1131 = vmatpush3.msra.mxu1 %v72_v15  ;;  %v301_v15 = vld [vmem:[#allocation3 + $0x20] sm:$0xff] }
  0x2c   :  { %1076 = vmatprep.subr.mxu0 %v71_v16  ;;  %1132 = vmatprep.subr.mxu1 %v71_v16 }
  0x2d   :  { %1077 = vmatpush3.msra.mxu0 %v71_v16  ;;  %1078 = vmatprep.mubr.f32.mxu0 %v103_v17 }
  0x2e   :  { %1133 = vmatpush3.msra.mxu1 %v71_v16  ;;  %1134 = vmatprep.mubr.f32.mxu1 %v313_v18  ;;  %v94_v18 = vld [vmem:[#allocation2 + $0x38] sm:$0xff] }
  0x2f   :  { %1079 = vmatmul.mubr.f32.vlgmr.msra.gmra.mxu0 %v104_v19  ;;  %1135 = vmatmul.mubr.f32.vlgmr.msra.gmra.mxu1 %v314_v20 }
  0x30   :  { %1081 = vmatprep.mubr.f32.mxu0 %v105_v21  ;;  %1137 = vmatprep.mubr.f32.mxu1 %v315_v22 }
  0x31   :  { %741 = vrot.lane.b32.xlu0 %v981_v23, %s1255_s21  ;;  %v304_v23 = vld [vmem:[#allocation3 + $0x38] sm:$0xff] }
  0x33   :  { %1082 = vmatmul.mubr.f32.gmra.mxu0 %v106_v24  ;;  %1138 = vmatmul.mubr.f32.gmra.mxu1 %v316_v25 }
  0x34   :  { %1084 = vmatprep.mubr.f32.mxu0 %v107_v26  ;;  %1140 = vmatprep.mubr.f32.mxu1 %v317_v27 }
  0x37   :  { %1085 = vmatmul.mubr.f32.gmra.mxu0 %v108_v28  ;;  %1141 = vmatmul.mubr.f32.gmra.mxu1 %v318_v29  ;;  %v93_v28 = vld [vmem:[#allocation2 + $0x30] sm:$0xff] }
  0x38   :  { %1087 = vmatprep.mubr.f32.mxu0 %v109_v30  ;;  %1143 = vmatprep.mubr.f32.mxu1 %v319_v31  ;;  %v303_v29 = vld [vmem:[#allocation3 + $0x30] sm:$0xff] }
  0x3b   :  { %1088 = vmatmul.mubr.f32.gmra.mxu0 %v110_v32  ;;  %1144 = vmatmul.mubr.f32.gmra.mxu1 %v320_v33  ;;  %v96_v32 = vld [vmem:[#allocation2 + $0x48] sm:$0xff] }
  0x3c   :  { %1090 = vmatprep.mubr.f32.mxu0 %v111_v34  ;;  %1146 = vmatprep.mubr.f32.mxu1 %v321_v35 }
  0x3f   :  { %1091 = vmatmul.mubr.f32.gmra.mxu0 %v112_v36  ;;  %1147 = vmatmul.mubr.f32.gmra.mxu1 %v322_v37  ;;  %v306_v37 = vld [vmem:[#allocation3 + $0x48] sm:$0xff] }
  0x40   :  { %1093 = vmatprep.mubr.f32.mxu0 %v113_v38  ;;  %1149 = vmatprep.mubr.f32.mxu1 %v323_v39 }
  0x43   :  { %1094 = vmatmul.mubr.f32.gmra.mxu0 %v114_v40  ;;  %1150 = vmatmul.mubr.f32.gmra.mxu1 %v324_v41 }
  0x44   :  { %1096 = vmatprep.mubr.f32.mxu0 %v115_v42  ;;  %1152 = vmatprep.mubr.f32.mxu1 %v325_v43  ;;  %v95_v42 = vld [vmem:[#allocation2 + $0x40] sm:$0xff] }
  0x45   :  { %v305_v43 = vld [vmem:[#allocation3 + $0x40] sm:$0xff] }
  0x47   :  { %1097 = vmatmul.mubr.f32.gmra.mxu0 %v116_v44  ;;  %1153 = vmatmul.mubr.f32.gmra.mxu1 %v326_v45 }
  0x48   :  { %1099 = vmatprep.mubr.f32.mxu0 %v117_v46  ;;  %1155 = vmatprep.mubr.f32.mxu1 %v327_v47  ;;  %v98_v46 = vld [vmem:[#allocation2 + $0x58] sm:$0xff] }
  0x4b   :  { %1100 = vmatmul.mubr.f32.gmra.mxu0 %v118_v48  ;;  %1156 = vmatmul.mubr.f32.gmra.mxu1 %v328_v49 }
  0xef   :  { %v1080_v52 = vpop.f32.mrf.mxu0  ;;  %v1136_v53 = vpop.f32.mrf.mxu1 }
  0xf0   :  { %v265_v56 = vadd.f32 %v1080_v52, %v88_v50  ;;  %v475_v57 = vadd.f32 %v1136_v53, %v298_v51  ;;  %v308_v51 = vld [vmem:[#allocation3 + $0x58] sm:$0xff] }
  0xf1   :  { %v185_v58 = vpop.f32.mrf.mxu0  ;;  %v395_v59 = vpop.f32.mrf.mxu1 }
  0xf2   :  { %282 = vst.msk [vmem:[#allocation2 + $0x8] sm:$0xff] %vm38_vm0, %v265_v56  ;;  %491 = vst.msk [vmem:[#allocation3 + $0x8] sm:$0xff] %vm38_vm0, %v475_v57  ;;  %v264_v62 = vadd.f32 %v185_v58, %v87_v54  ;;  %v474_v63 = vadd.f32 %v395_v59, %v297_v55  ;;  %v97_v56 = vld [vmem:[#allocation2 + $0x50] sm:$0xff] }
  0xf3   :  { %v1083_v0 = vpop.f32.mrf.mxu0  ;;  %v1139_v1 = vpop.f32.mrf.mxu1  ;;  %v307_v57 = vld [vmem:[#allocation3 + $0x50] sm:$0xff] }
  0xf4   :  { %281 = vst.msk [vmem:[#allocation2] sm:$0xff] %vm38_vm0, %v264_v62  ;;  %490 = vst.msk [vmem:[#allocation3] sm:$0xff] %vm38_vm0, %v474_v63  ;;  %v267_v4 = vadd.f32 %v1083_v0, %v90_v60  ;;  %v477_v5 = vadd.f32 %v1139_v1, %v300_v61  ;;  %v100_v60 = vld [vmem:[#allocation2 + $0x68] sm:$0xff] }
  0xf5   :  { %v195_v6 = vpop.f32.mrf.mxu0  ;;  %v405_v7 = vpop.f32.mrf.mxu1  ;;  %v310_v1 = vld [vmem:[#allocation3 + $0x68] sm:$0xff] }
  0xf6   :  { %284 = vst.msk [vmem:[#allocation2 + $0x18] sm:$0xff] %vm38_vm0, %v267_v4  ;;  %493 = vst.msk [vmem:[#allocation3 + $0x18] sm:$0xff] %vm38_vm0, %v477_v5  ;;  %v266_v10 = vadd.f32 %v195_v6, %v89_v2  ;;  %v476_v11 = vadd.f32 %v405_v7, %v299_v3  ;;  %v99_v6 = vld [vmem:[#allocation2 + $0x60] sm:$0xff] }
  0xf7   :  { %v1086_v12 = vpop.f32.mrf.mxu0  ;;  %v1142_v13 = vpop.f32.mrf.mxu1  ;;  %v309_v7 = vld [vmem:[#allocation3 + $0x60] sm:$0xff] }
  0xf8   :  { %283 = vst.msk [vmem:[#allocation2 + $0x10] sm:$0xff] %vm38_vm0, %v266_v10  ;;  %492 = vst.msk [vmem:[#allocation3 + $0x10] sm:$0xff] %vm38_vm0, %v476_v11  ;;  %v269_v16 = vadd.f32 %v1086_v12, %v92_v8  ;;  %v479_v17 = vadd.f32 %v1142_v13, %v302_v9  ;;  %v102_v10 = vld [vmem:[#allocation2 + $0x78] sm:$0xff] }
  0xf9   :  { %v205_v19 = vpop.f32.mrf.mxu0  ;;  %v415_v20 = vpop.f32.mrf.mxu1  ;;  %v1436_v21 = vld [vmem:[#allocation3 + $0x8] sm:$0xff] }
  0xfa   :  { %v1438_v22 = vld [vmem:[#allocation2 + $0x8] sm:$0xff]  ;;  %286 = vst.msk [vmem:[#allocation2 + $0x28] sm:$0xff] %vm38_vm0, %v269_v16  ;;  %495 = vst.msk [vmem:[#allocation3 + $0x28] sm:$0xff] %vm38_vm0, %v479_v17  ;;  %v268_v24 = vadd.f32 %v205_v19, %v91_v14  ;;  %v478_v25 = vadd.f32 %v415_v20, %v301_v15  ;;  %560 = vrot.lane.b32.xlu1 %v1436_v21, %s1256_s0  ;;  %v312_v15 = vld [vmem:[#allocation3 + $0x78] sm:$0xff] }
  0xfb   :  { %658 = vrot.lane.b32.xlu0 %v1438_v22, %s1257_s17  ;;  %v1089_v26 = vpop.f32.mrf.mxu0  ;;  %v1145_v27 = vpop.f32.mrf.mxu1  ;;  %v1448_v35 = vld [vmem:[#allocation3] sm:$0xff]  ;;  %v101_v20 = vld [vmem:[#allocation2 + $0x70] sm:$0xff] }
  0xfc   :  { %285 = vst.msk [vmem:[#allocation2 + $0x20] sm:$0xff] %vm38_vm0, %v268_v24  ;;  %494 = vst.msk [vmem:[#allocation3 + $0x20] sm:$0xff] %vm38_vm0, %v478_v25  ;;  %v271_v30 = vadd.f32 %v1089_v26, %v94_v18  ;;  %v481_v31 = vadd.f32 %v1145_v27, %v304_v23  ;;  %v1450_v36 = vld [vmem:[#allocation2] sm:$0xff]  ;;  %v311_v23 = vld [vmem:[#allocation3 + $0x70] sm:$0xff]  ;;  %v1494_v24 = vpop.permute.xlu0 %741 }
  0xfd   :  { %v215_v33 = vpop.f32.mrf.mxu0  ;;  %v425_v34 = vpop.f32.mrf.mxu1  ;;  %v1460_v49 = vld [vmem:[#allocation3 + $0x18] sm:$0xff] }
  0xfe   :  { %288 = vst.msk [vmem:[#allocation2 + $0x38] sm:$0xff] %vm38_vm0, %v271_v30  ;;  %497 = vst.msk [vmem:[#allocation3 + $0x38] sm:$0xff] %vm38_vm0, %v481_v31  ;;  %v270_v38 = vadd.f32 %v215_v33, %v93_v28  ;;  %v480_v39 = vadd.f32 %v425_v34, %v303_v29  ;;  %656 = vrot.lane.b32.xlu1 %v1450_v36, %s1257_s17  ;;  %v1472_v63 = vld [vmem:[#allocation2 + $0x18] sm:$0xff]  ;;  %v745_v33 = vadd.f32 %v1494_v24, %v1438_v22 }
  0xff   :  { %558 = vrot.lane.b32.xlu0 %v1448_v35, %s1256_s0  ;;  %v1092_v40 = vpop.f32.mrf.mxu0  ;;  %v1148_v41 = vpop.f32.mrf.mxu1  ;;  %v1462_v50 = vld [vmem:[#allocation3 + $0x10] sm:$0xff]  ;;  %v744_v34 = vadd.f32 %v1494_v24, %v1450_v36 }
 0x100   :  { %287 = vst.msk [vmem:[#allocation2 + $0x30] sm:$0xff] %vm38_vm0, %v270_v38  ;;  %496 = vst.msk [vmem:[#allocation3 + $0x30] sm:$0xff] %vm38_vm0, %v480_v39  ;;  %v273_v44 = vadd.f32 %v1092_v40, %v96_v32  ;;  %v483_v45 = vadd.f32 %v1148_v41, %v306_v37  ;;  %v1474_v0 = vld [vmem:[#allocation2 + $0x10] sm:$0xff]  ;;  %v777_v39 = vadd.f32 %v1494_v24, %v1436_v21  ;;  %1165 = vtanh.f32 %v745_v33 }
 0x101   :  { %v225_v47 = vpop.f32.mrf.mxu0  ;;  %v435_v48 = vpop.f32.mrf.mxu1  ;;  %v1484_v13 = vld [vmem:[#allocation3 + $0x28] sm:$0xff]  ;;  %v776_v40 = vadd.f32 %v1494_v24, %v1448_v35  ;;  %1167 = vtanh.f32 %v744_v34 }
 0x102   :  { %290 = vst.msk [vmem:[#allocation2 + $0x48] sm:$0xff] %vm38_vm0, %v273_v44  ;;  %499 = vst.msk [vmem:[#allocation3 + $0x48] sm:$0xff] %vm38_vm0, %v483_v45  ;;  %v272_v52 = vadd.f32 %v225_v47, %v95_v42  ;;  %v482_v53 = vadd.f32 %v435_v48, %v305_v43  ;;  %562 = vrot.lane.b32.xlu1 %v1462_v50, %s1256_s0  ;;  %v1498_v29 = vld [vmem:[#allocation2 + $0x28] sm:$0xff]  ;;  %1169 = vtanh.f32 %v777_v39 }
 0x103   :  { %564 = vrot.lane.b32.xlu0 %v1460_v49, %s1256_s0  ;;  %v1095_v54 = vpop.f32.mrf.mxu0  ;;  %v1151_v55 = vpop.f32.mrf.mxu1  ;;  %v1486_v14 = vld [vmem:[#allocation3 + $0x20] sm:$0xff]  ;;  %1171 = vtanh.f32 %v776_v40  ;;  %v747_v47 = vadd.f32 %v1494_v24, %v1472_v63 }
 0x104   :  { %289 = vst.msk [vmem:[#allocation2 + $0x40] sm:$0xff] %vm38_vm0, %v272_v52  ;;  %498 = vst.msk [vmem:[#allocation3 + $0x40] sm:$0xff] %vm38_vm0, %v482_v53  ;;  %v275_v58 = vadd.f32 %v1095_v54, %v98_v46  ;;  %v485_v59 = vadd.f32 %v1151_v55, %v308_v51  ;;  %v1500_v30 = vld [vmem:[#allocation2 + $0x20] sm:$0xff]  ;;  %v746_v51 = vadd.f32 %v1494_v24, %v1474_v0 }
 0x105   :  { %v235_v61 = vpop.f32.mrf.mxu0  ;;  %v445_v62 = vpop.f32.mrf.mxu1  ;;  %v1514_v37 = vld [vmem:[#allocation3 + $0x38] sm:$0xff]  ;;  %v779_v53 = vadd.f32 %v1494_v24, %v1460_v49  ;;  %1173 = vtanh.f32 %v747_v47  ;;  %v778_v55 = vadd.f32 %v1494_v24, %v1462_v50 }
 0x106   :  { %292 = vst.msk [vmem:[#allocation2 + $0x58] sm:$0xff] %vm38_vm0, %v275_v58  ;;  %501 = vst.msk [vmem:[#allocation3 + $0x58] sm:$0xff] %vm38_vm0, %v485_v59  ;;  %v274_v2 = vadd.f32 %v235_v61, %v97_v56  ;;  %v484_v3 = vadd.f32 %v445_v62, %v307_v57  ;;  %660 = vrot.lane.b32.xlu1 %v1474_v0, %s1257_s17  ;;  %v1526_v41 = vld [vmem:[#allocation2 + $0x38] sm:$0xff]  ;;  %1175 = vtanh.f32 %v746_v51 }
 0x107   :  { %662 = vrot.lane.b32.xlu0 %v1472_v63, %s1257_s17  ;;  %v1098_v4 = vpop.f32.mrf.mxu0  ;;  %v1154_v5 = vpop.f32.mrf.mxu1  ;;  %v1516_v38 = vld [vmem:[#allocation3 + $0x30] sm:$0xff]  ;;  %1177 = vtanh.f32 %v779_v53  ;;  %v749_v61 = vadd.f32 %v1494_v24, %v1498_v29 }
 0x108   :  { %291 = vst.msk [vmem:[#allocation2 + $0x50] sm:$0xff] %vm38_vm0, %v274_v2  ;;  %500 = vst.msk [vmem:[#allocation3 + $0x50] sm:$0xff] %vm38_vm0, %v484_v3  ;;  %v277_v8 = vadd.f32 %v1098_v4, %v100_v60  ;;  %v487_v9 = vadd.f32 %v1154_v5, %v310_v1  ;;  %v1528_v42 = vld [vmem:[#allocation2 + $0x30] sm:$0xff]  ;;  %1179 = vtanh.f32 %v778_v55  ;;  %v748_v1 = vadd.f32 %v1494_v24, %v1500_v30 }
 0x109   :  { %v245_v11 = vpop.f32.mrf.mxu0  ;;  %v455_v12 = vpop.f32.mrf.mxu1  ;;  %v1534_v43 = vld [vmem:[#allocation3 + $0x48] sm:$0xff]  ;;  %v781_v3 = vadd.f32 %v1494_v24, %v1484_v13  ;;  %1181 = vtanh.f32 %v749_v61  ;;  %v780_v5 = vadd.f32 %v1494_v24, %v1486_v14 }
 0x10a   :  { %294 = vst.msk [vmem:[#allocation2 + $0x68] sm:$0xff] %vm38_vm0, %v277_v8  ;;  %503 = vst.msk [vmem:[#allocation3 + $0x68] sm:$0xff] %vm38_vm0, %v487_v9  ;;  %v276_v16 = vadd.f32 %v245_v11, %v99_v6  ;;  %v486_v17 = vadd.f32 %v455_v12, %v309_v7  ;;  %566 = vrot.lane.b32.xlu1 %v1486_v14, %s1256_s0  ;;  %v1542_v45 = vld [vmem:[#allocation2 + $0x48] sm:$0xff]  ;;  %1183 = vtanh.f32 %v748_v1 }
 0x10b   :  { %568 = vrot.lane.b32.xlu0 %v1484_v13, %s1256_s0  ;;  %v1101_v18 = vpop.f32.mrf.mxu0  ;;  %v1157_v19 = vpop.f32.mrf.mxu1  ;;  %v1536_v44 = vld [vmem:[#allocation3 + $0x40] sm:$0xff]  ;;  %1185 = vtanh.f32 %v781_v3  ;;  %v751_v11 = vadd.f32 %v1494_v24, %v1526_v41 }
 0x10c   :  { %293 = vst.msk [vmem:[#allocation2 + $0x60] sm:$0xff] %vm38_vm0, %v276_v16  ;;  %502 = vst.msk [vmem:[#allocation3 + $0x60] sm:$0xff] %vm38_vm0, %v486_v17  ;;  %v279_v25 = vadd.f32 %v1101_v18, %v102_v10  ;;  %v489_v26 = vadd.f32 %v1157_v19, %v312_v15  ;;  %v1544_v46 = vld [vmem:[#allocation2 + $0x40] sm:$0xff]  ;;  %1187 = vtanh.f32 %v780_v5  ;;  %v750_v15 = vadd.f32 %v1494_v24, %v1528_v42 }
 0x10d   :  { %v255_v27 = vpop.f32.mrf.mxu0  ;;  %v465_v28 = vpop.f32.mrf.mxu1  ;;  %v1562_v57 = vld [vmem:[#allocation3 + $0x58] sm:$0xff]  ;;  %v783_v17 = vadd.f32 %v1494_v24, %v1514_v37  ;;  %1189 = vtanh.f32 %v751_v11  ;;  %v782_v19 = vadd.f32 %v1494_v24, %v1516_v38 }
 0x10e   :  { %296 = vst.msk [vmem:[#allocation2 + $0x78] sm:$0xff] %vm38_vm0, %v279_v25  ;;  %505 = vst.msk [vmem:[#allocation3 + $0x78] sm:$0xff] %vm38_vm0, %v489_v26  ;;  %v278_v31 = vadd.f32 %v255_v27, %v101_v20  ;;  %v488_v32 = vadd.f32 %v465_v28, %v311_v23  ;;  %664 = vrot.lane.b32.xlu1 %v1500_v30, %s1257_s17  ;;  %v1166_v48 = vpop.eup %1165  ;;  %v1570_v59 = vld [vmem:[#allocation2 + $0x58] sm:$0xff]  ;;  %1191 = vtanh.f32 %v750_v15 }
 0x10f   :  { %666 = vrot.lane.b32.xlu0 %v1498_v29, %s1257_s17  ;;  %v1168_v52 = vpop.eup %1167  ;;  %v1564_v58 = vld [vmem:[#allocation3 + $0x50] sm:$0xff]  ;;  %1193 = vtanh.f32 %v783_v17  ;;  %v753_v23 = vadd.f32 %v1494_v24, %v1542_v45  ;;  %v752_v25 = vadd.f32 %v1494_v24, %v1544_v46  ;;  %v785_v28 = vadd.f32 %v1494_v24, %v1534_v43 }
 0x110   :  { %295 = vst.msk [vmem:[#allocation2 + $0x70] sm:$0xff] %vm38_vm0, %v278_v31  ;;  %504 = vst.msk [vmem:[#allocation3 + $0x70] sm:$0xff] %vm38_vm0, %v488_v32  ;;  %v1170_v54 = vpop.eup %1169  ;;  %v1572_v60 = vld [vmem:[#allocation2 + $0x50] sm:$0xff]  ;;  %1195 = vtanh.f32 %v782_v19  ;;  %v784_v31 = vadd.f32 %v1494_v24, %v1536_v44  ;;  %v755_v34 = vadd.f32 %v1494_v24, %v1570_v59 }
 0x111   :  { %v1172_v56 = vpop.eup %1171  ;;  %v1590_v7 = vld [vmem:[#allocation3 + $0x68] sm:$0xff]  ;;  %1197 = vtanh.f32 %v753_v23  ;;  %v754_v40 = vadd.f32 %v1494_v24, %v1572_v60 }
 0x112   :  { %570 = vrot.lane.b32.xlu1 %v1516_v38, %s1256_s0  ;;  %v1174_v62 = vpop.eup %1173  ;;  %v1598_v9 = vld [vmem:[#allocation2 + $0x68] sm:$0xff]  ;;  %1199 = vtanh.f32 %v752_v25 }
 0x113   :  { %572 = vrot.lane.b32.xlu0 %v1514_v37, %s1256_s0  ;;  %v1176_v2 = vpop.eup %1175  ;;  %v1592_v8 = vld [vmem:[#allocation3 + $0x60] sm:$0xff]  ;;  %1201 = vtanh.f32 %v785_v28 }
 0x114   :  { %v1178_v4 = vpop.eup %1177  ;;  %v1600_v10 = vld [vmem:[#allocation2 + $0x60] sm:$0xff]  ;;  %1203 = vtanh.f32 %v784_v31 }
 0x115   :  { %v1180_v6 = vpop.eup %1179  ;;  %v1622_v26 = vld [vmem:[#allocation3 + $0x78] sm:$0xff]  ;;  %1205 = vtanh.f32 %v755_v34 }
 0x116   :  { %668 = vrot.lane.b32.xlu1 %v1528_v42, %s1257_s17  ;;  %v1182_v12 = vpop.eup %1181  ;;  %v1634_v32 = vld [vmem:[#allocation2 + $0x78] sm:$0xff]  ;;  %1207 = vtanh.f32 %v754_v40 }
 0x117   :  { %670 = vrot.lane.b32.xlu0 %v1526_v41, %s1257_s17  ;;  %v1184_v16 = vpop.eup %1183  ;;  %v1624_v27 = vld [vmem:[#allocation3 + $0x70] sm:$0xff] }
 0x118   :  { %v1186_v18 = vpop.eup %1185  ;;  %v1636_v33 = vld [vmem:[#allocation2 + $0x70] sm:$0xff] }
 0x119   :  { %v1188_v20 = vpop.eup %1187 }
 0x11a   :  { %574 = vrot.lane.b32.xlu1 %v1536_v44, %s1256_s0  ;;  %v1190_v39 = vpop.eup %1189 }
 0x11b   :  { %576 = vrot.lane.b32.xlu0 %v1534_v43, %s1256_s0  ;;  %v1192_v47 = vpop.eup %1191 }
 0x11c   :  { %v1194_v51 = vpop.eup %1193 }
 0x11d   :  { %v1196_v53 = vpop.eup %1195 }
 0x11e   :  { %672 = vrot.lane.b32.xlu1 %v1544_v46, %s1257_s17  ;;  %v1198_v55 = vpop.eup %1197 }
 0x11f   :  { %674 = vrot.lane.b32.xlu0 %v1542_v45, %s1257_s17  ;;  %v1200_v61 = vpop.eup %1199 }
 0x120   :  { %v1202_v1 = vpop.eup %1201 }
 0x121   :  { %v1204_v3 = vpop.eup %1203 }
 0x122   :  { %824 = vrot.lane.b32.xlu1 %v1168_v52, %s1255_s21  ;;  %v786_v52 = vadd.f32 %v1494_v24, %v1564_v58  ;;  %v1206_v5 = vpop.eup %1205 }
 0x123   :  { %826 = vrot.lane.b32.xlu0 %v1166_v48, %s1255_s21  ;;  %v787_v48 = vadd.f32 %v1494_v24, %v1562_v57  ;;  %v1208_v11 = vpop.eup %1207 }
 0x125   :  { %1209 = vtanh.f32 %v787_v48 }
 0x126   :  { %888 = vrot.lane.b32.xlu1 %v1172_v56, %s1257_s17  ;;  %1211 = vtanh.f32 %v786_v52  ;;  %v756_v56 = vadd.f32 %v1494_v24, %v1600_v10 }
 0x127   :  { %890 = vrot.lane.b32.xlu0 %v1170_v54, %s1257_s17  ;;  %v757_v54 = vadd.f32 %v1494_v24, %v1598_v9 }
 0x129   :  { %1213 = vtanh.f32 %v757_v54 }
 0x12a   :  { %578 = vrot.lane.b32.xlu1 %v1564_v58, %s1256_s0  ;;  %1215 = vtanh.f32 %v756_v56 }
 0x12b   :  { %580 = vrot.lane.b32.xlu0 %v1562_v57, %s1256_s0 }
 0x12e   :  { %676 = vrot.lane.b32.xlu1 %v1572_v60, %s1257_s17 }
 0x12f   :  { %678 = vrot.lane.b32.xlu0 %v1570_v59, %s1257_s17 }
 0x132   :  { %828 = vrot.lane.b32.xlu1 %v1176_v2, %s1255_s21  ;;  %v788_v2 = vadd.f32 %v1494_v24, %v1592_v8  ;;  %v1210_v15 = vpop.eup %1209 }
 0x133   :  { %830 = vrot.lane.b32.xlu0 %v1174_v62, %s1255_s21  ;;  %v789_v62 = vadd.f32 %v1494_v24, %v1590_v7  ;;  %v1212_v17 = vpop.eup %1211 }
 0x135   :  { %1217 = vtanh.f32 %v789_v62 }
 0x136   :  { %892 = vrot.lane.b32.xlu1 %v1180_v6, %s1257_s17  ;;  %1219 = vtanh.f32 %v788_v2  ;;  %v758_v6 = vadd.f32 %v1494_v24, %v1636_v33 }
 0x137   :  { %894 = vrot.lane.b32.xlu0 %v1178_v4, %s1257_s17  ;;  %v759_v4 = vadd.f32 %v1494_v24, %v1634_v32 }
 0x139   :  { %1221 = vtanh.f32 %v759_v4 }
 0x13a   :  { %582 = vrot.lane.b32.xlu1 %v1592_v8, %s1256_s0  ;;  %1223 = vtanh.f32 %v758_v6 }
 0x13b   :  { %584 = vrot.lane.b32.xlu0 %v1590_v7, %s1256_s0 }
 0x13e   :  { %680 = vrot.lane.b32.xlu1 %v1600_v10, %s1257_s17 }
 0x13f   :  { %682 = vrot.lane.b32.xlu0 %v1598_v9, %s1257_s17 }
 0x142   :  { %832 = vrot.lane.b32.xlu1 %v1184_v16, %s1255_s21  ;;  %v790_v16 = vadd.f32 %v1494_v24, %v1624_v27 }
 0x143   :  { %834 = vrot.lane.b32.xlu0 %v1182_v12, %s1255_s21  ;;  %v791_v12 = vadd.f32 %v1494_v24, %v1622_v26 }
 0x145   :  { %1225 = vtanh.f32 %v791_v12 }
 0x146   :  { %896 = vrot.lane.b32.xlu1 %v1188_v20, %s1257_s17  ;;  %1227 = vtanh.f32 %v790_v16 }
 0x147   :  { %898 = vrot.lane.b32.xlu0 %v1186_v18, %s1257_s17  ;;  %v1214_v18 = vpop.eup %1213 }
 0x148   :  { %v1216_v19 = vpop.eup %1215 }
 0x149   :  { %v1218_v20 = vpop.eup %1217 }
 0x14a   :  { %586 = vrot.lane.b32.xlu1 %v1624_v27, %s1256_s0  ;;  %v1220_v24 = vpop.eup %1219 }
 0x14b   :  { %588 = vrot.lane.b32.xlu0 %v1622_v26, %s1256_s0  ;;  %v1222_v34 = vpop.eup %1221 }
 0x14c   :  { %v1224_v40 = vpop.eup %1223 }
 0x14e   :  { %684 = vrot.lane.b32.xlu1 %v1636_v33, %s1257_s17 }
 0x14f   :  { %686 = vrot.lane.b32.xlu0 %v1634_v32, %s1257_s17 }
 0x152   :  { %836 = vrot.lane.b32.xlu1 %v1192_v47, %s1255_s21  ;;  %v1226_v48 = vpop.eup %1225 }
 0x153   :  { %838 = vrot.lane.b32.xlu0 %v1190_v39, %s1255_s21  ;;  %v1228_v52 = vpop.eup %1227 }
 0x156   :  { %900 = vrot.lane.b32.xlu1 %v1196_v53, %s1257_s17 }
 0x157   :  { %902 = vrot.lane.b32.xlu0 %v1194_v51, %s1257_s17 }
 0x15a   :  { %840 = vrot.lane.b32.xlu1 %v1200_v61, %s1255_s21 }
 0x15b   :  { %842 = vrot.lane.b32.xlu0 %v1198_v55, %s1255_s21 }
 0x15e   :  { %904 = vrot.lane.b32.xlu1 %v1204_v3, %s1257_s17 }
 0x15f   :  { %906 = vrot.lane.b32.xlu0 %v1202_v1, %s1257_s17 }
 0x162   :  { %844 = vrot.lane.b32.xlu1 %v1208_v11, %s1255_s21 }
 0x163   :  { %846 = vrot.lane.b32.xlu0 %v1206_v5, %s1255_s21 }
 0x166   :  { %908 = vrot.lane.b32.xlu1 %v1212_v17, %s1257_s17 }
 0x167   :  { %910 = vrot.lane.b32.xlu0 %v1210_v15, %s1257_s17 }
 0x16a   :  { %848 = vrot.lane.b32.xlu1 %v1216_v19, %s1255_s21 }
 0x16b   :  { %850 = vrot.lane.b32.xlu0 %v1214_v18, %s1255_s21 }
 0x16c   :  { %v561_v23 = vpop.permute.xlu1 %560 }
 0x16d   :  { %v659_v25 = vpop.permute.xlu0 %658  ;;  %v608_v28 = vsel %vm606_vm1, %v1438_v22, %v561_v23 }
 0x16e   :  { %v705_v31 = vsel %vm606_vm1, %v659_v25, %v1436_v21  ;;  %625 = vst.msk [vmem:[%s1962_s4 + $0x8] sm:$0xff] %vm623_vm2, %v608_v28  ;;  %912 = vrot.lane.b32.xlu1 %v1220_v24, %s1257_s17 }
 0x16f   :  { %721 = vst.msk [vmem:[%s1963_s5 + $0x8] sm:$0xff] %vm623_vm2, %v705_v31  ;;  %914 = vrot.lane.b32.xlu0 %v1218_v20, %s1257_s17 }
 0x170   :  { %v657_v22 = vpop.permute.xlu1 %656 }
 0x171   :  { %v559_v39 = vpop.permute.xlu0 %558  ;;  %v704_v47 = vsel %vm606_vm1, %v657_v22, %v1448_v35 }
 0x172   :  { %v607_v21 = vsel %vm606_vm1, %v1450_v36, %v559_v39  ;;  %720 = vst.msk [vmem:[%s1963_s5] sm:$0xff] %vm623_vm2, %v704_v47  ;;  %852 = vrot.lane.b32.xlu1 %v1224_v40, %s1255_s21 }
 0x173   :  { %624 = vst.msk [vmem:[%s1962_s4] sm:$0xff] %vm623_vm2, %v607_v21  ;;  %854 = vrot.lane.b32.xlu0 %v1222_v34, %s1255_s21 }
 0x174   :  { %v563_v36 = vpop.permute.xlu1 %562 }
 0x175   :  { %v565_v51 = vpop.permute.xlu0 %564  ;;  %v609_v53 = vsel %vm606_vm1, %v1474_v0, %v563_v36 }
 0x176   :  { %v610_v35 = vsel %vm606_vm1, %v1472_v63, %v565_v51  ;;  %626 = vst.msk [vmem:[%s1962_s4 + $0x10] sm:$0xff] %vm623_vm2, %v609_v53  ;;  %916 = vrot.lane.b32.xlu1 %v1228_v52, %s1257_s17 }
 0x177   :  { %627 = vst.msk [vmem:[%s1962_s4 + $0x18] sm:$0xff] %vm623_vm2, %v610_v35  ;;  %918 = vrot.lane.b32.xlu0 %v1226_v48, %s1257_s17 }
 0x178   :  { %v661_v55 = vpop.permute.xlu1 %660 }
 0x179   :  { %v663_v54 = vpop.permute.xlu0 %662  ;;  %v706_v0 = vsel %vm606_vm1, %v661_v55, %v1462_v50 }
 0x17a   :  { %v707_v63 = vsel %vm606_vm1, %v663_v54, %v1460_v49  ;;  %722 = vst.msk [vmem:[%s1963_s5 + $0x10] sm:$0xff] %vm623_vm2, %v706_v0 }
 0x17b   :  { %723 = vst.msk [vmem:[%s1963_s5 + $0x18] sm:$0xff] %vm623_vm2, %v707_v63 }
 0x17c   :  { %v567_v61 = vpop.permute.xlu1 %566 }
 0x17d   :  { %v569_v56 = vpop.permute.xlu0 %568  ;;  %v611_v49 = vsel %vm606_vm1, %v1500_v30, %v567_v61 }
 0x17e   :  { %v612_v62 = vsel %vm606_vm1, %v1498_v29, %v569_v56  ;;  %628 = vst.msk [vmem:[%s1962_s4 + $0x20] sm:$0xff] %vm623_vm2, %v611_v49 }
 0x17f   :  { %629 = vst.msk [vmem:[%s1962_s4 + $0x28] sm:$0xff] %vm623_vm2, %v612_v62 }
 0x180   :  { %v665_v1 = vpop.permute.xlu1 %664 }
 0x181   :  { %v667_v50 = vpop.permute.xlu0 %666  ;;  %v708_v29 = vsel %vm606_vm1, %v665_v1, %v1486_v14 }
 0x182   :  { %v709_v2 = vsel %vm606_vm1, %v667_v50, %v1484_v13  ;;  %724 = vst.msk [vmem:[%s1963_s5 + $0x20] sm:$0xff] %vm623_vm2, %v708_v29 }
 0x183   :  { %725 = vst.msk [vmem:[%s1963_s5 + $0x28] sm:$0xff] %vm623_vm2, %v709_v2 }
 0x184   :  { %v571_v3 = vpop.permute.xlu1 %570 }
 0x185   :  { %v573_v30 = vpop.permute.xlu0 %572  ;;  %v613_v13 = vsel %vm606_vm1, %v1528_v42, %v571_v3 }
 0x186   :  { %v614_v4 = vsel %vm606_vm1, %v1526_v41, %v573_v30  ;;  %630 = vst.msk [vmem:[%s1962_s4 + $0x30] sm:$0xff] %vm623_vm2, %v613_v13 }
 0x187   :  { %631 = vst.msk [vmem:[%s1962_s4 + $0x38] sm:$0xff] %vm623_vm2, %v614_v4 }
 0x188   :  { %v669_v5 = vpop.permute.xlu1 %668 }
 0x189   :  { %v671_v14 = vpop.permute.xlu0 %670  ;;  %v710_v41 = vsel %vm606_vm1, %v669_v5, %v1516_v38 }
 0x18a   :  { %v711_v6 = vsel %vm606_vm1, %v671_v14, %v1514_v37  ;;  %726 = vst.msk [vmem:[%s1963_s5 + $0x30] sm:$0xff] %vm623_vm2, %v710_v41 }
 0x18b   :  { %727 = vst.msk [vmem:[%s1963_s5 + $0x38] sm:$0xff] %vm623_vm2, %v711_v6 }
 0x18c   :  { %v575_v11 = vpop.permute.xlu1 %574 }
 0x18d   :  { %v577_v42 = vpop.permute.xlu0 %576  ;;  %v615_v37 = vsel %vm606_vm1, %v1544_v46, %v575_v11 }
 0x18e   :  { %v616_v12 = vsel %vm606_vm1, %v1542_v45, %v577_v42  ;;  %632 = vst.msk [vmem:[%s1962_s4 + $0x40] sm:$0xff] %vm623_vm2, %v615_v37 }
 0x18f   :  { %633 = vst.msk [vmem:[%s1962_s4 + $0x48] sm:$0xff] %vm623_vm2, %v616_v12 }
 0x190   :  { %v673_v15 = vpop.permute.xlu1 %672 }
 0x191   :  { %v675_v38 = vpop.permute.xlu0 %674  ;;  %v712_v45 = vsel %vm606_vm1, %v673_v15, %v1536_v44 }
 0x192   :  { %v713_v16 = vsel %vm606_vm1, %v675_v38, %v1534_v43  ;;  %728 = vst.msk [vmem:[%s1963_s5 + $0x40] sm:$0xff] %vm623_vm2, %v712_v45 }
 0x193   :  { %729 = vst.msk [vmem:[%s1963_s5 + $0x48] sm:$0xff] %vm623_vm2, %v713_v16 }
 0x194   :  { %v825_v17 = vpop.permute.xlu1 %824 }
 0x195   :  { %v827_v46 = vpop.permute.xlu0 %826 }
 0x198   :  { %v889_v19 = vpop.permute.xlu1 %888 }
 0x199   :  { %v891_v18 = vpop.permute.xlu0 %890  ;;  %v936_v43 = vsel %vm606_vm1, %v825_v17, %v889_v19 }
 0x19a   :  { %v937_v20 = vsel %vm606_vm1, %v827_v46, %v891_v18  ;;  %952 = vst.msk [vmem:[%s1964_s6] sm:$0xff] %vm623_vm2, %v936_v43 }
 0x19b   :  { %953 = vst.msk [vmem:[%s1964_s6 + $0x8] sm:$0xff] %vm623_vm2, %v937_v20 }
 0x19c   :  { %v579_v23 = vpop.permute.xlu1 %578 }
 0x19d   :  { %v581_v44 = vpop.permute.xlu0 %580  ;;  %v617_v24 = vsel %vm606_vm1, %v1572_v60, %v579_v23 }
 0x19e   :  { %v618_v25 = vsel %vm606_vm1, %v1570_v59, %v581_v44  ;;  %634 = vst.msk [vmem:[%s1962_s4 + $0x50] sm:$0xff] %vm623_vm2, %v617_v24 }
 0x19f   :  { %635 = vst.msk [vmem:[%s1962_s4 + $0x58] sm:$0xff] %vm623_vm2, %v618_v25 }
 0x1a0   :  { %v677_v31 = vpop.permute.xlu1 %676 }
 0x1a1   :  { %v679_v28 = vpop.permute.xlu0 %678  ;;  %v714_v59 = vsel %vm606_vm1, %v677_v31, %v1564_v58 }
 0x1a2   :  { %v715_v34 = vsel %vm606_vm1, %v679_v28, %v1562_v57  ;;  %730 = vst.msk [vmem:[%s1963_s5 + $0x50] sm:$0xff] %vm623_vm2, %v714_v59 }
 0x1a3   :  { %731 = vst.msk [vmem:[%s1963_s5 + $0x58] sm:$0xff] %vm623_vm2, %v715_v34 }
 0x1a4   :  { %v829_v39 = vpop.permute.xlu1 %828 }
 0x1a5   :  { %v831_v60 = vpop.permute.xlu0 %830 }
 0x1a8   :  { %v893_v40 = vpop.permute.xlu1 %892 }
 0x1a9   :  { %v895_v22 = vpop.permute.xlu0 %894  ;;  %v938_v57 = vsel %vm606_vm1, %v829_v39, %v893_v40 }
 0x1aa   :  { %v939_v21 = vsel %vm606_vm1, %v831_v60, %v895_v22  ;;  %954 = vst.msk [vmem:[%s1964_s6 + $0x10] sm:$0xff] %vm623_vm2, %v938_v57 }
 0x1ab   :  { %955 = vst.msk [vmem:[%s1964_s6 + $0x18] sm:$0xff] %vm623_vm2, %v939_v21 }
 0x1ac   :  { %v583_v47 = vpop.permute.xlu1 %582 }
 0x1ad   :  { %v585_v58 = vpop.permute.xlu0 %584  ;;  %v619_v51 = vsel %vm606_vm1, %v1600_v10, %v583_v47 }
 0x1ae   :  { %v620_v48 = vsel %vm606_vm1, %v1598_v9, %v585_v58  ;;  %636 = vst.msk [vmem:[%s1962_s4 + $0x60] sm:$0xff] %vm623_vm2, %v619_v51 }
 0x1af   :  { %637 = vst.msk [vmem:[%s1962_s4 + $0x68] sm:$0xff] %vm623_vm2, %v620_v48 }
 0x1b0   :  { %v681_v52 = vpop.permute.xlu1 %680 }
 0x1b1   :  { %v683_v36 = vpop.permute.xlu0 %682  ;;  %v716_v9 = vsel %vm606_vm1, %v681_v52, %v1592_v8 }
 0x1b2   :  { %v717_v35 = vsel %vm606_vm1, %v683_v36, %v1590_v7  ;;  %732 = vst.msk [vmem:[%s1963_s5 + $0x60] sm:$0xff] %vm623_vm2, %v716_v9 }
 0x1b3   :  { %733 = vst.msk [vmem:[%s1963_s5 + $0x68] sm:$0xff] %vm623_vm2, %v717_v35 }
 0x1b4   :  { %v833_v53 = vpop.permute.xlu1 %832 }
 0x1b5   :  { %v835_v10 = vpop.permute.xlu0 %834 }
 0x1b8   :  { %v897_v55 = vpop.permute.xlu1 %896 }
 0x1b9   :  { %v899_v54 = vpop.permute.xlu0 %898  ;;  %v940_v7 = vsel %vm606_vm1, %v833_v53, %v897_v55 }
 0x1ba   :  { %v941_v63 = vsel %vm606_vm1, %v835_v10, %v899_v54  ;;  %956 = vst.msk [vmem:[%s1964_s6 + $0x20] sm:$0xff] %vm623_vm2, %v940_v7 }
 0x1bb   :  { %957 = vst.msk [vmem:[%s1964_s6 + $0x28] sm:$0xff] %vm623_vm2, %v941_v63 }
 0x1bc   :  { %v587_v0 = vpop.permute.xlu1 %586 }
 0x1bd   :  { %v589_v8 = vpop.permute.xlu0 %588  ;;  %v621_v61 = vsel %vm606_vm1, %v1636_v33, %v587_v0 }
 0x1be   :  { %v622_v56 = vsel %vm606_vm1, %v1634_v32, %v589_v8  ;;  %638 = vst.msk [vmem:[%s1962_s4 + $0x70] sm:$0xff] %vm623_vm2, %v621_v61 }
 0x1bf   :  { %639 = vst.msk [vmem:[%s1962_s4 + $0x78] sm:$0xff] %vm623_vm2, %v622_v56 }
 0x1c0   :  { %v685_v49 = vpop.permute.xlu1 %684 }
 0x1c1   :  { %v687_v62 = vpop.permute.xlu0 %686  ;;  %v718_v32 = vsel %vm606_vm1, %v685_v49, %v1624_v27 }
 0x1c2   :  { %v719_v50 = vsel %vm606_vm1, %v687_v62, %v1622_v26  ;;  %734 = vst.msk [vmem:[%s1963_s5 + $0x70] sm:$0xff] %vm623_vm2, %v718_v32 }
 0x1c3   :  { %735 = vst.msk [vmem:[%s1963_s5 + $0x78] sm:$0xff] %vm623_vm2, %v719_v50 }
 0x1c4   :  { %v837_v1 = vpop.permute.xlu1 %836 }
 0x1c5   :  { %v839_v33 = vpop.permute.xlu0 %838 }
 0x1c8   :  { %v901_v29 = vpop.permute.xlu1 %900 }
 0x1c9   :  { %v903_v2 = vpop.permute.xlu0 %902  ;;  %v942_v26 = vsel %vm606_vm1, %v837_v1, %v901_v29 }
 0x1ca   :  { %v943_v30 = vsel %vm606_vm1, %v839_v33, %v903_v2  ;;  %958 = vst.msk [vmem:[%s1964_s6 + $0x30] sm:$0xff] %vm623_vm2, %v942_v26 }
 0x1cb   :  { %959 = vst.msk [vmem:[%s1964_s6 + $0x38] sm:$0xff] %vm623_vm2, %v943_v30 }
 0x1cc   :  { %v841_v3 = vpop.permute.xlu1 %840 }
 0x1cd   :  { %v843_v27 = vpop.permute.xlu0 %842 }
 0x1d0   :  { %v905_v13 = vpop.permute.xlu1 %904 }
 0x1d1   :  { %v907_v4 = vpop.permute.xlu0 %906  ;;  %v944_v5 = vsel %vm606_vm1, %v841_v3, %v905_v13 }
 0x1d2   :  { %v945_v14 = vsel %vm606_vm1, %v843_v27, %v907_v4  ;;  %960 = vst.msk [vmem:[%s1964_s6 + $0x40] sm:$0xff] %vm623_vm2, %v944_v5 }
 0x1d3   :  { %961 = vst.msk [vmem:[%s1964_s6 + $0x48] sm:$0xff] %vm623_vm2, %v945_v14 }
 0x1d4   :  { %v845_v41 = vpop.permute.xlu1 %844 }
 0x1d5   :  { %v847_v6 = vpop.permute.xlu0 %846 }
 0x1d8   :  { %v909_v11 = vpop.permute.xlu1 %908 }
 0x1d9   :  { %v911_v42 = vpop.permute.xlu0 %910  ;;  %v946_v37 = vsel %vm606_vm1, %v845_v41, %v909_v11 }
 0x1da   :  { %v947_v12 = vsel %vm606_vm1, %v847_v6, %v911_v42  ;;  %962 = vst.msk [vmem:[%s1964_s6 + $0x50] sm:$0xff] %vm623_vm2, %v946_v37 }
 0x1db   :  { %963 = vst.msk [vmem:[%s1964_s6 + $0x58] sm:$0xff] %vm623_vm2, %v947_v12 }
 0x1dc   :  { %v849_v15 = vpop.permute.xlu1 %848 }
 0x1dd   :  { %v851_v38 = vpop.permute.xlu0 %850 }
 0x1e0   :  { %v913_v45 = vpop.permute.xlu1 %912 }
 0x1e1   :  { %v915_v16 = vpop.permute.xlu0 %914  ;;  %v948_v17 = vsel %vm606_vm1, %v849_v15, %v913_v45 }
 0x1e2   :  { %v949_v46 = vsel %vm606_vm1, %v851_v38, %v915_v16  ;;  %964 = vst.msk [vmem:[%s1964_s6 + $0x60] sm:$0xff] %vm623_vm2, %v948_v17 }
 0x1e3   :  { %965 = vst.msk [vmem:[%s1964_s6 + $0x68] sm:$0xff] %vm623_vm2, %v949_v46 }
 0x1e4   :  { %v853_v19 = vpop.permute.xlu1 %852 }
 0x1e5   :  { %v855_v18 = vpop.permute.xlu0 %854 }
 0x1e8   :  { %v917_v43 = vpop.permute.xlu1 %916 }
 0x1e9   :  { %v919_v20 = vpop.permute.xlu0 %918  ;;  %v950_v23 = vsel %vm606_vm1, %v853_v19, %v917_v43 }
 0x1ea   :  { %v951_v44 = vsel %vm606_vm1, %v855_v18, %v919_v20  ;;  %966 = vst.msk [vmem:[%s1964_s6 + $0x70] sm:$0xff] %vm623_vm2, %v950_v23 }
 0x1eb   :  { %967 = vst.msk [vmem:[%s1964_s6 + $0x78] sm:$0xff] %vm623_vm2, %v951_v44 }
 0x1ec   :  { %980 = vsyncpa [#allocation5], 1 }

</bundles_post_ra>
